<compile_context>
chip_gen: v6e
topology: v6e:2x2x1
jax: 0.10.0
libtpu: 0.0.40
codegen_flags: <defaults>
</compile_context>

<pallas_src>
import math
import functools

import jax
import jax.numpy as jnp
from jax import lax
from jax.experimental import pallas as pl
from jax.experimental.pallas import tpu as pltpu


# ----------------------------------------------------------------------------
# Tiling helper
# ----------------------------------------------------------------------------
def _fit_tile(dim, target, align):
    """Largest `align`-multiple <= target that divides `dim`, else the full dim."""
    if dim <= target:
        return dim
    t = (target // align) * align
    while t >= align:
        if dim % t == 0:
            return t
        t -= align
    return dim


# ----------------------------------------------------------------------------
# Tiled linear kernel: (M,K) @ (K,N) + bias
# ----------------------------------------------------------------------------
def _linear_kernel(x_ref, w_ref, b_ref, o_ref, acc_ref):
    k = pl.program_id(2)

    @pl.when(k == 0)
    def _init():
        acc_ref[...] = jnp.zeros(acc_ref.shape, acc_ref.dtype)

    acc_ref[...] += jnp.dot(x_ref[...], w_ref[...],
                            preferred_element_type=jnp.float32)

    @pl.when(k == pl.num_programs(2) - 1)
    def _done():
        o_ref[...] = (acc_ref[...] + b_ref[...].astype(jnp.float32)).astype(o_ref.dtype)


def linear_pallas(x2d, w_t, b, *, tm_target=256, tn_target=256, tk_target=512):
    M, K = x2d.shape
    K2, N = w_t.shape
    assert K == K2
    tm = _fit_tile(M, tm_target, 8)
    tn = _fit_tile(N, tn_target, 128)
    tk = _fit_tile(K, tk_target, 128)
    b2d = b.reshape(1, N)
    flops = 2 * M * N * K
    bytes_accessed = (M * K + K * N + M * N + N) * x2d.dtype.itemsize
    return pl.pallas_call(
        _linear_kernel,
        out_shape=jax.ShapeDtypeStruct((M, N), x2d.dtype),
        grid=(M // tm, N // tn, K // tk),
        in_specs=[
            pl.BlockSpec((tm, tk), lambda i, j, k: (i, k)),
            pl.BlockSpec((tk, tn), lambda i, j, k: (k, j)),
            pl.BlockSpec((1, tn), lambda i, j, k: (0, j)),
        ],
        out_specs=pl.BlockSpec((tm, tn), lambda i, j, k: (i, j)),
        scratch_shapes=[pltpu.VMEM((tm, tn), jnp.float32)],
        compiler_params=pltpu.CompilerParams(
            dimension_semantics=("parallel", "parallel", "arbitrary")),
        cost_estimate=pl.CostEstimate(flops=flops, transcendentals=0,
                                      bytes_accessed=bytes_accessed),
    )(x2d, w_t, b2d)


# ----------------------------------------------------------------------------
# In-kernel RoPE helpers (half layout: lanes [:hs2] = rot dims, [hs2:] = pass dims)
# ----------------------------------------------------------------------------
def _shift_right_one(x, *, negate_wrap):
    """cat([±x[:, -1:], x[:, :-1]], axis=-1): wrap-around shift by one lane."""
    w = x.shape[-1]
    if w % 128 == 0:
        # Native lane rotate on the (otherwise idle) XLU slot.
        rolled = pltpu.roll(x, shift=1, axis=x.ndim - 1)
        if negate_wrap:
            lane = lax.broadcasted_iota(jnp.int32, x.shape, x.ndim - 1)
            rolled = jnp.where(lane == 0, -rolled, rolled)
        return rolled
    head = -x[:, -1:] if negate_wrap else x[:, -1:]
    return jnp.concatenate([head, x[:, :-1]], axis=-1)


def _rope_half_layout(xh, cos, sin):
    """RoPE for one head tile already permuted to half layout.

    Numerically identical to apply_rope on the original interleaved layout up
    to that fixed permutation, which q and k share, so q.k^T is unchanged.
    """
    hs2 = cos.shape[-1]
    xe = xh[:, :hs2].astype(jnp.float32)   # x_rot
    xo = xh[:, hs2:].astype(jnp.float32)   # x_pass
    new_e = xe * cos - _shift_right_one(xo, negate_wrap=True) * sin
    new_o = xo * cos + _shift_right_one(xe, negate_wrap=False) * sin
    return jnp.concatenate([new_e, new_o], axis=-1)


# ----------------------------------------------------------------------------
# Flash-style causal attention kernel (all heads per grid step)
# ----------------------------------------------------------------------------
def _flash_attn_kernel(q_ref, k_ref, v_ref, cq_ref, sq_ref, ck_ref, sk_ref,
                       o_ref, m_ref, l_ref, acc_ref, qr_ref, *, n_head):
    qi = pl.program_id(1)
    ki = pl.program_id(2)
    nk = pl.num_programs(2)
    tq, C = q_ref.shape
    tkv = k_ref.shape[0]
    hs = C // n_head

    @pl.when(ki == 0)
    def _init():
        m_ref[...] = jnp.full(m_ref.shape, -jnp.inf, dtype=m_ref.dtype)
        l_ref[...] = jnp.zeros(l_ref.shape, l_ref.dtype)
        acc_ref[...] = jnp.zeros(acc_ref.shape, acc_ref.dtype)
        # RoPE'd + pre-scaled q (cos_q/sin_q carry 1/sqrt(hs)); cached in VMEM
        # so it is not recomputed on every kv step.
        cq = cq_ref[...]
        sq = sq_ref[...]
        q_all = q_ref[...]
        for h in range(n_head):
            sl = slice(h * hs, (h + 1) * hs)
            qr_ref[:, sl] = _rope_half_layout(q_all[:, sl], cq, sq).astype(qr_ref.dtype)

    q_start = qi * tq
    k_start = ki * tkv

    @pl.when(k_start <= q_start + tq - 1)       # skip kv blocks above the diagonal
    def _compute():
        k_all = k_ref[...]
        v_all = v_ref[...]
        ck = ck_ref[...]
        sk = sk_ref[...]
        # Causal additive bias, built once per kv step and shared by all heads.
        row = q_start + lax.broadcasted_iota(jnp.int32, (tq, tkv), 0)
        col = k_start + lax.broadcasted_iota(jnp.int32, (tq, tkv), 1)
        bias = jnp.where(col <= row, 0.0, -1e30).astype(jnp.float32)
        dn = (((1,), (1,)), ((), ()))           # q @ k^T, contraction over full hs
        for h in range(n_head):
            sl = slice(h * hs, (h + 1) * hs)
            kh = _rope_half_layout(k_all[:, sl], ck, sk).astype(k_all.dtype)
            qh = qr_ref[:, sl]
            s = lax.dot_general(qh, kh, dn,
                                preferred_element_type=jnp.float32) + bias
            m_prev = m_ref[:, h:h + 1]
            l_prev = l_ref[:, h:h + 1]
            m_new = jnp.maximum(m_prev, jnp.max(s, axis=-1, keepdims=True))
            alpha = jnp.exp(m_prev - m_new)
            p = jnp.exp(s - m_new)
            l_ref[:, h:h + 1] = alpha * l_prev + jnp.sum(p, axis=-1, keepdims=True)
            acc_ref[:, sl] = alpha * acc_ref[:, sl] + jnp.dot(
                p.astype(v_all.dtype), v_all[:, sl],
                preferred_element_type=jnp.float32)
            m_ref[:, h:h + 1] = m_new

    @pl.when(ki == nk - 1)
    def _finalize():
        # One EUP reciprocal over all heads, then per-head normalize.
        inv_all = pl.reciprocal(l_ref[...], approx=True)
        for h in range(n_head):
            sl = slice(h * hs, (h + 1) * hs)
            o_ref[:, sl] = (acc_ref[:, sl] * inv_all[:, h:h + 1]).astype(o_ref.dtype)


# ----------------------------------------------------------------------------
# Module forward (wrapper / glue)
# ----------------------------------------------------------------------------
def causal_self_attention(x, Wa, ba, Wp, bp, n_head, *, q_tile=128, kv_tile=128):
    B, T, C = x.shape
    hs = C // n_head
    hs2 = hs // 2
    assert hs % 2 == 0

    # --- one-time weight repack (would be done at load time in practice) -----
    # Split c_attn into q/k/v projections (head split then happens for free via
    # the attention BlockSpecs) and fold the even/odd RoPE de-interleave of the
    # head dim into the q/k output features.  v and the attention output keep
    # the original layout, so c_proj is unchanged.
    d_half = jnp.concatenate([jnp.arange(0, hs, 2), jnp.arange(1, hs, 2)])
    perm = (jnp.arange(n_head)[:, None] * hs + d_half[None, :]).reshape(-1)
    Wq, Wk, Wv = Wa[:C], Wa[C:2 * C], Wa[2 * C:]
    bq, bk, bv = ba[:C], ba[C:2 * C], ba[2 * C:]
    Wq, bq = Wq[perm], bq[perm]
    Wk, bk = Wk[perm], bk[perm]

    # --- q/k/v projections (tiled Pallas matmuls, no split/transpose after) --
    x2d = x.reshape(B * T, C)
    q = linear_pallas(x2d, Wq.T, bq).reshape(B, T, C)
    k = linear_pallas(x2d, Wk.T, bk).reshape(B, T, C)
    v = linear_pallas(x2d, Wv.T, bv).reshape(B, T, C)

    # --- RoPE cache (== precompute_rope_cache(hs, max(T,32))[:T]) ------------
    pos = jnp.arange(T, dtype=jnp.float32)
    dim_pos = jnp.arange(0, hs, 2, dtype=jnp.float32)
    freq = 1.0 / (10000.0 ** (dim_pos / hs))
    ang = jnp.outer(pos, freq)
    cos = jnp.cos(ang)
    sin = jnp.sin(ang)
    scale = 1.0 / math.sqrt(hs)
    cos_q = (cos * scale).astype(jnp.float32)   # fold 1/sqrt(hs) into q side
    sin_q = (sin * scale).astype(jnp.float32)
    cos_k = cos.astype(jnp.float32)
    sin_k = sin.astype(jnp.float32)

    tq = _fit_tile(T, q_tile, 8)
    tkv = _fit_tile(T, kv_tile, 8)
    grid = (B, T // tq, T // tkv)

    # Advisory cost model (causal ~halves useful flops; exp count per score).
    attn_flops = 2 * B * n_head * T * T * hs        # qk^T + pv, upper bound
    attn_trans = B * n_head * T * T
    attn_bytes = (4 * B * T * C) * x.dtype.itemsize  # q, k, v read + y write

    kernel = functools.partial(_flash_attn_kernel, n_head=n_head)
    y = pl.pallas_call(
        kernel,
        out_shape=jax.ShapeDtypeStruct((B, T, C), x.dtype),
        grid_spec=pltpu.PrefetchScalarGridSpec(
            num_scalar_prefetch=0,
            grid=grid,
            in_specs=[
                pl.BlockSpec((None, tq, C), lambda b, i, j: (b, i, 0)),   # q
                pl.BlockSpec((None, tkv, C), lambda b, i, j: (b, j, 0)),  # k
                pl.BlockSpec((None, tkv, C), lambda b, i, j: (b, j, 0)),  # v
                pl.BlockSpec((tq, hs2), lambda b, i, j: (i, 0)),          # cos_q (scaled)
                pl.BlockSpec((tq, hs2), lambda b, i, j: (i, 0)),          # sin_q (scaled)
                pl.BlockSpec((tkv, hs2), lambda b, i, j: (j, 0)),         # cos_k
                pl.BlockSpec((tkv, hs2), lambda b, i, j: (j, 0)),         # sin_k
            ],
            out_specs=pl.BlockSpec((None, tq, C), lambda b, i, j: (b, i, 0)),
            scratch_shapes=[
                pltpu.VMEM((tq, n_head), jnp.float32),   # m (running max)
                pltpu.VMEM((tq, n_head), jnp.float32),   # l (running denom)
                pltpu.VMEM((tq, C), jnp.float32),        # acc
                pltpu.VMEM((tq, C), x.dtype),            # RoPE'd + scaled q
            ]),
        compiler_params=pltpu.CompilerParams(
            dimension_semantics=("parallel", "parallel", "arbitrary")),
        cost_estimate=pl.CostEstimate(flops=attn_flops,
                                      transcendentals=attn_trans,
                                      bytes_accessed=attn_bytes),
    )(q, k, v, cos_q, sin_q, cos_k, sin_k)

    # --- output projection ----------------------------------------------------
    out = linear_pallas(y.reshape(B * T, C), Wp.T, bp)
    # TODO(synk): attn_dropout / resid_dropout not applied (eval mode, p = 0).
    return out.reshape(B, T, C)


# ----------------------------------------------------------------------------
# Pure-JAX reference (mirrors the PyTorch forward exactly) for validation.
# ----------------------------------------------------------------------------
def reference_forward(x, Wa, ba, Wp, bp, n_head):
    B, T, C = x.shape
    hs = C // n_head
    qkv = x @ Wa.T + ba
    q, k, v = jnp.split(qkv, 3, axis=-1)

    def heads(t):
        return t.reshape(B, T, n_head, hs).transpose(0, 2, 1, 3)

    q, k, v = heads(q), heads(k), heads(v)

    pos = jnp.arange(T, dtype=jnp.float32)
    dim_pos = jnp.arange(0, hs, 2, dtype=jnp.float32)
    freq = 1.0 / (10000.0 ** (dim_pos / hs))
    ang = jnp.outer(pos, freq)
    cos = jnp.cos(ang)[None, None]
    sin = jnp.sin(ang)[None, None]

    def rope(xx):
        x_rot, x_pass = xx[..., ::2], xx[..., 1::2]
        sh_p = jnp.concatenate([-x_pass[..., -1:], x_pass[..., :-1]], axis=-1)
        sh_r = jnp.concatenate([x_rot[..., -1:], x_rot[..., :-1]], axis=-1)
        xr_new = x_rot * cos - sh_p * sin
        xp_new = x_pass * cos + sh_r * sin
        return jnp.stack([xr_new, xp_new], axis=-1).reshape(xx.shape)

    q, k = rope(q), rope(k)
    att = (q @ jnp.swapaxes(k, -1, -2)) / math.sqrt(hs)
    mask = jnp.tril(jnp.ones((T, T), dtype=bool))
    att = jnp.where(mask, att, -jnp.inf)
    att = jax.nn.softmax(att, axis=-1)
    y = (att @ v).transpose(0, 2, 1, 3).reshape(B, T, C)
    return y @ Wp.T + bp


if __name__ == "__main__":
    B, T, C, n_head = 2, 8, 32, 4

    key = jax.random.PRNGKey(0)
    kx, kwa, kba, kwp, kbp = jax.random.split(key, 5)
    x = jax.random.normal(kx, (B, T, C), jnp.float32)
    # Deterministic synthetic parameters (shapes from nn.Linear in __init__).
    Wa = jax.random.normal(kwa, (3 * C, C), jnp.float32) / math.sqrt(C)  # c_attn.weight
    ba = jax.random.normal(kba, (3 * C,), jnp.float32) * 0.1             # c_attn.bias
    Wp = jax.random.normal(kwp, (C, C), jnp.float32) / math.sqrt(C)      # c_proj.weight
    bp = jax.random.normal(kbp, (C,), jnp.float32) * 0.1                 # c_proj.bias

    out = causal_self_attention(x, Wa, ba, Wp, bp, n_head)
    out = jax.block_until_ready(out)

    ref = reference_forward(x, Wa, ba, Wp, bp, n_head)
    assert out.shape == (B, T, C)
    max_err = float(jnp.max(jnp.abs(out - ref)))
    assert jnp.allclose(out, ref, rtol=2e-2, atol=2e-2), f"max abs err = {max_err}"
    print("KERNEL_OK")
</pallas_src>

<mosaic_0001>
module attributes {stable_mosaic.version = 11 : i64} {
  func.func @_linear_kernel(%arg0: i32, %arg1: i32, %arg2: i32, %arg3: memref<16x32xf32, #tpu.memory_space<vmem>>, %arg4: memref<32x32xf32, #tpu.memory_space<vmem>>, %arg5: memref<1x32xf32, #tpu.memory_space<vmem>>, %arg6: memref<16x32xf32, #tpu.memory_space<vmem>>, %arg7: memref<16x32xf32, #tpu.memory_space<vmem>>) attributes {dimension_semantics = [#tpu.dimension_semantics<parallel>, #tpu.dimension_semantics<parallel>, #tpu.dimension_semantics<arbitrary>], iteration_bounds = array<i64: 1, 1, 1>, scalar_prefetch = 0 : i64, scratch_operands = 1 : i64, tpu.core_type = #tpu.core_type<tc>, window_params = [{transform_indices = @transform_0, window_bounds = array<i64: 16, 32>}, {transform_indices = @transform_1, window_bounds = array<i64: 32, 32>}, {transform_indices = @transform_2, window_bounds = array<i64: 1, 32>}, {transform_indices = @transform_3, window_bounds = array<i64: 16, 32>}]} {
    %c0_i32 = arith.constant 0 : i32
    %0 = arith.cmpi eq, %arg2, %c0_i32 : i32
    %1 = arith.extui %0 : i1 to i32
    %c0_i32_0 = arith.constant 0 : i32
    %2 = arith.cmpi ne, %1, %c0_i32_0 : i32
    scf.if %2 {
      %cst_10 = arith.constant 0.000000e+00 : f32
      %12 = vector.broadcast %cst_10 : f32 to vector<16x32xf32>
      %c0_11 = arith.constant 0 : index
      %c0_12 = arith.constant 0 : index
      %13 = vector.load %arg7[%c0_11, %c0_12] : memref<16x32xf32, #tpu.memory_space<vmem>>, vector<16x32xf32>
      tpu.vector_store %arg7[%c0_11, %c0_12], %12 {strides = array<i32>} : memref<16x32xf32, #tpu.memory_space<vmem>>, vector<16x32xf32>,
    } else {
    }
    %c0 = arith.constant 0 : index
    %c0_1 = arith.constant 0 : index
    %3 = vector.load %arg7[%c0, %c0_1] : memref<16x32xf32, #tpu.memory_space<vmem>>, vector<16x32xf32>
    %c0_2 = arith.constant 0 : index
    %c0_3 = arith.constant 0 : index
    %4 = vector.load %arg3[%c0_2, %c0_3] : memref<16x32xf32, #tpu.memory_space<vmem>>, vector<16x32xf32>
    %c0_4 = arith.constant 0 : index
    %c0_5 = arith.constant 0 : index
    %5 = vector.load %arg4[%c0_4, %c0_5] : memref<32x32xf32, #tpu.memory_space<vmem>>, vector<32x32xf32>
    %cst = arith.constant dense<0.000000e+00> : vector<16x32xf32>
    %6 = tpu.matmul %4, %5, %cst {dimension_numbers = #tpu.dot_dimension_numbers<[1], [0], [0], [1], [0, 0, 1, 1], [], []>} : vector<16x32xf32>, vector<32x32xf32>, vector<16x32xf32> -> vector<16x32xf32>
    %7 = arith.addf %3, %6 : vector<16x32xf32>
    %c0_6 = arith.constant 0 : index
    %c0_7 = arith.constant 0 : index
    %8 = vector.load %arg7[%c0_6, %c0_7] : memref<16x32xf32, #tpu.memory_space<vmem>>, vector<16x32xf32>
    tpu.vector_store %arg7[%c0_6, %c0_7], %7 {strides = array<i32>} : memref<16x32xf32, #tpu.memory_space<vmem>>, vector<16x32xf32>,
    %c0_i32_8 = arith.constant 0 : i32
    %9 = arith.cmpi eq, %arg2, %c0_i32_8 : i32
    %10 = arith.extui %9 : i1 to i32
    %c0_i32_9 = arith.constant 0 : i32
    %11 = arith.cmpi ne, %10, %c0_i32_9 : i32
    scf.if %11 {
      %c0_10 = arith.constant 0 : index
      %c0_11 = arith.constant 0 : index
      %12 = vector.load %arg7[%c0_10, %c0_11] : memref<16x32xf32, #tpu.memory_space<vmem>>, vector<16x32xf32>
      %c0_12 = arith.constant 0 : index
      %c0_13 = arith.constant 0 : index
      %13 = vector.load %arg5[%c0_12, %c0_13] : memref<1x32xf32, #tpu.memory_space<vmem>>, vector<1x32xf32>
      %14 = vector.broadcast %13 : vector<1x32xf32> to vector<16x32xf32>
      %15 = arith.addf %12, %14 : vector<16x32xf32>
      %c0_14 = arith.constant 0 : index
      %c0_15 = arith.constant 0 : index
      %16 = vector.load %arg6[%c0_14, %c0_15] : memref<16x32xf32, #tpu.memory_space<vmem>>, vector<16x32xf32>
      tpu.vector_store %arg6[%c0_14, %c0_15], %15 {strides = array<i32>} : memref<16x32xf32, #tpu.memory_space<vmem>>, vector<16x32xf32>,
    } else {
    }
    return
  }
  func.func @transform_0(%arg0: i32, %arg1: i32, %arg2: i32) -> (i32, i32) {
    %c0_i32 = arith.constant 0 : i32
    return %arg0, %arg2 : i32, i32
  }
  func.func @transform_1(%arg0: i32, %arg1: i32, %arg2: i32) -> (i32, i32) {
    %c0_i32 = arith.constant 0 : i32
    return %arg2, %arg1 : i32, i32
  }
  func.func @transform_2(%arg0: i32, %arg1: i32, %arg2: i32) -> (i32, i32) {
    %c0_i32 = arith.constant 0 : i32
    %c0_i32_0 = arith.constant 0 : i32
    return %c0_i32, %arg1 : i32, i32
  }
  func.func @transform_3(%arg0: i32, %arg1: i32, %arg2: i32) -> (i32, i32) {
    %c0_i32 = arith.constant 0 : i32
    return %arg0, %arg1 : i32, i32
  }
}

</mosaic_0001>

<bundles_post_ra>
// kernel: tpu_custom_call.1
= control target key start
LH: loop header
LB: loop body
LE: loop exit
PB: predicated region body
PF: predicated region fallthrough
CT: control target
= control target key end

     0   :  { %8 = vsyncpa [#allocation4], 0  ;;  %s325_s0 = inlined_call_operand.hbm [shape: f32[16,32], index: 0, kind: input, shape index: {}]   ;;  %s326_s1 = inlined_call_operand.hbm [shape: f32[32,32], index: 1, kind: input, shape index: {}]   ;;  %s327_s2 = inlined_call_operand.vmem [shape: f32[1,32], index: 2, kind: input, shape index: {}]   ;;  %s328_s3 = inlined_call_operand.hbm [shape: f32[16,32], index: 3, kind: output, shape index: {}]  }
   0x1   :  { %9 = vsyncpa [#allocation7], 0 }
   0x2   :  { %10 = vsyncpa [#allocation5], 0  ;;  %s270_s12 = smov [#allocation3]  }
   0x3   :  { %s16_s13 = sshll.u32 %s270_s12, 4  ;;  %s17_s13 = int_to_ptr.vmem [resolvable:$true] %s16_s13 }
   0x4   :  { %s212_s14 = scalar_lea.vmem %s17_s13, 256  ;;  %p217_p1 = scmp.lt.s32.totalorder %s17_s13, %s17_s13 }
   0x5   :  { %p213_p0 = scmp.ne.s32.totalorder %s17_s13, %s212_s14  ;;  %p218_p2 = scmp.lt.s32.totalorder %s212_s14, %s212_s14 }
   0x7   :  { %p219_p3 = por %p218_p2, %p217_p1 }
   0x9   :  { %p220_p4 = pnand %p219_p3, %p213_p0 }
   0xb   :  { %223 = shalt.err (!%p220_p4)
}
   0xc   :  { %s271_s15 = smov 128   ;;  %s272_s16 = smov 8  }
   0xd   :  { %22 = dma.hbm_to_vmem [thread:$0]  %s325_s0, 256, %s17_s13, [#allocation4], %s271_s15, %s271_s15, %s272_s16  }
   0xe   :  { %s273_s19 = smov [#allocation6]  }
   0xf   :  { %s28_s20 = sshll.u32 %s273_s19, 4  ;;  %s29_s20 = int_to_ptr.vmem [resolvable:$true] %s28_s20 }
  0x10   :  { %s232_s21 = scalar_lea.vmem %s29_s20, 512  ;;  %p237_p6 = scmp.lt.s32.totalorder %s29_s20, %s29_s20 }
  0x11   :  { %p233_p5 = scmp.ne.s32.totalorder %s29_s20, %s232_s21  ;;  %p238_p7 = scmp.lt.s32.totalorder %s232_s21, %s232_s21 }
  0x13   :  { %p239_p8 = por %p238_p7, %p237_p6 }
  0x15   :  { %p240_p9 = pnand %p239_p8, %p233_p5 }
  0x17   :  { %243 = shalt.err (!%p240_p9)
}
  0x18   :  { %34 = dma.hbm_to_vmem [thread:$0]  %s326_s1, 512, %s29_s20, [#allocation7], %s271_s15, %s271_s15, %s272_s16  }
  0x19   :  { %264 = dma.done.wait [#allocation4], 256  }
  0x1a   :  { %265 = vsyncadd [#allocation4], 4294967040 }
  0x1b   :  { %266 = dma.done.wait [#allocation7], 512  }
  0x1c   :  { %267 = vsyncadd [#allocation7], 4294966784  ;;  %vm47_vm0 = vcmask 261120   ;;  %v274_v0 = vmov 0.0   ;;  %v57_v1 = vld [vmem:[#allocation6 + $0x18] sm:$0xff]  ;;  %v56_v2 = vld [vmem:[#allocation6 + $0x10] sm:$0xff] }
  0x1d   :  { %49 = vst.msk [vmem:[#allocation2 + $0x8] sm:$0xff] %vm47_vm0, %v274_v0  ;;  %48 = vst.msk [vmem:[#allocation2] sm:$0xff] %vm47_vm0, %v274_v0  ;;  %187 = vmatprep.subr.mxu0 %v57_v1  ;;  %v52_v3 = vld [vmem:[#allocation3] sm:$0xff]  ;;  %v55_v4 = vld [vmem:[#allocation6 + $0x8] sm:$0xff]  ;;  %s275_s24 = smov [#allocation8]  }
  0x1e   :  { %188 = vmatpush3.msra.mxu0 %v57_v1  ;;  %195 = vmatprep.mubr.msk.f32.mxu0 %vm47_vm0, %v52_v3  ;;  %v54_v5 = vld [vmem:[#allocation6] sm:$0xff]  ;;  %v53_v6 = vld [vmem:[#allocation3 + $0x8] sm:$0xff]  ;;  %s165_s25 = sshll.u32 %s275_s24, 4  ;;  %s166_s25 = int_to_ptr.vmem [resolvable:$true] %s165_s25 }
  0x1f   :  { %189 = vmatprep.subr.mxu0 %v56_v2  ;;  %v180_v13 = vld [vmem:[%s327_s2] ss:$0 sm:$0xff]  ;;  %s244_s26 = scalar_lea.vmem %s166_s25, 256  ;;  %p249_p11 = scmp.lt.s32.totalorder %s166_s25, %s166_s25 }
  0x20   :  { %190 = vmatpush3.msra.mxu0 %v56_v2  ;;  %p245_p10 = scmp.ne.s32.totalorder %s166_s25, %s244_s26  ;;  %p250_p12 = scmp.lt.s32.totalorder %s244_s26, %s244_s26 }
  0x21   :  { %191 = vmatprep.subr.mxu0 %v55_v4 }
  0x22   :  { %192 = vmatpush3.msra.mxu0 %v55_v4  ;;  %p251_p13 = por %p250_p12, %p249_p11 }
  0x23   :  { %193 = vmatprep.subr.mxu0 %v54_v5 }
  0x24   :  { %194 = vmatpush3.msra.mxu0 %v54_v5  ;;  %v51_v7 = vld [vmem:[#allocation2 + $0x8] sm:$0xff]  ;;  %v50_v9 = vld [vmem:[#allocation2] sm:$0xff]  ;;  %p252_p0 = pnand %p251_p13, %p245_p10 }
  0x25   :  { %196 = vmatmul.mubr.msk.f32.vlgmr.msra.gmra.mxu0 %vm47_vm0, %v53_v6 }
  0xe5   :  { %v197_v8 = vpop.f32.mrf.mxu0 }
  0xe6   :  { %v141_v10 = vadd.f32 %v197_v8, %v51_v7 }
  0xe7   :  { %v131_v11 = vpop.f32.mrf.mxu0 }
  0xe8   :  { %143 = vst.msk [vmem:[#allocation2 + $0x8] sm:$0xff] %vm47_vm0, %v141_v10  ;;  %v140_v12 = vadd.f32 %v131_v11, %v50_v9 }
  0xea   :  { %142 = vst.msk [vmem:[#allocation2] sm:$0xff] %vm47_vm0, %v140_v12 }
  0xef   :  { %v148_v14 = vld [vmem:[#allocation2 + $0x8] sm:$0xff] }
  0xf0   :  { %v157_v15 = vadd.f32 %v180_v13, %v148_v14 }
  0xf1   :  { %v147_v16 = vld [vmem:[#allocation2] sm:$0xff] }
  0xf2   :  { %v156_v17 = vadd.f32 %v180_v13, %v147_v16  ;;  %159 = vst.msk [vmem:[#allocation8 + $0x8] sm:$0xff] %vm47_vm0, %v157_v15 }
  0xf4   :  { %158 = vst.msk [vmem:[#allocation8] sm:$0xff] %vm47_vm0, %v156_v17 }
  0xf5   :  { %255 = shalt.err (!%p252_p0)
}
  0xf6   :  { %171 = dma.vmem_to_hbm [thread:$0]  %s166_s25, 256, %s328_s3, [#allocation5], %s271_s15, %s271_s15, %s272_s16  }
  0xf7   :  { %268 = dma.done.wait [#allocation5], 256  }
  0xf8   :  { %269 = vsyncadd [#allocation5], 4294967040 }
  0xf9   :  { %175 = vsyncpa [#allocation4], 1 }
  0xfa   :  { %176 = vsyncpa [#allocation7], 1 }
  0xfb   :  { %177 = vsyncpa [#allocation5], 1 }

</bundles_post_ra>
